<compile_context>
chip_gen: v6e
topology: v6e:2x2x1
jax: 0.10.0
libtpu: 0.0.40
codegen_flags: <defaults>
</compile_context>

<pallas_src>
import jax
import jax.numpy as jnp
from jax.experimental import pallas as pl
from jax.experimental.pallas import tpu as pltpu


def _round_up(v, m):
    return (v + m - 1) // m * m


def _global_model_kernel(
    idx_ref,   # (1, R) i32 : [node_index | edge_index | arange(B_pad)]
    dyn_ref,   # (R, K_pad) f32 : block-diag [x ; edge_attr ; u], zero elsewhere
    par_ref,   # (K_pad + H + 4, H) f32 : [w1_reordered_pad ; w2 ; b1;b2;gamma;beta]
    out_ref,   # (B_pad, H) f32
):
    B_pad, H = out_ref.shape
    R, K_pad = dyn_ref.shape

    # ---- fused scatter-sum + concat via ONE one-hot MXU matmul --------------
    # Column j selects dyn row j for graph idx[j]; the trailing B_pad columns
    # are an identity block that copies u through.  Indices >= B land in
    # padded output rows that are sliced away by the wrapper (segment_sum drop
    # semantics); padded u rows are zero and contribute nothing.
    onehot = (jax.lax.broadcasted_iota(jnp.int32, (B_pad, R), 0)
              == idx_ref[...]).astype(jnp.float32)                    # (B_pad, R)
    cat = jnp.dot(onehot, dyn_ref[...],
                  preferred_element_type=jnp.float32)                 # (B_pad, K_pad)

    # ---- static, 8-aligned slices of the single param slab ------------------
    w1 = par_ref[0:K_pad, :]                                          # (K_pad, H)
    w2 = par_ref[K_pad:K_pad + H, :]                                  # (H, H)
    vec = par_ref[K_pad + H:K_pad + H + 4, :]                         # (4, H)
    b1, b2, gamma, beta = vec[0:1], vec[1:2], vec[2:3], vec[3:4]

    # ---- MLP: Linear -> ReLU -> (Dropout=Identity) -> Linear ----------------
    h = jnp.dot(cat, w1, preferred_element_type=jnp.float32) + b1
    h = jnp.maximum(h, 0.0)
    h2 = jnp.dot(h, w2, preferred_element_type=jnp.float32) + b2

    # ---- LayerNorm over hidden dim (eps=1e-5, biased variance) --------------
    mean = jnp.mean(h2, axis=-1, keepdims=True)
    var = jnp.mean(jnp.square(h2 - mean), axis=-1, keepdims=True)
    out_ref[...] = (h2 - mean) * jax.lax.rsqrt(var + 1e-5) * gamma + beta


def pack_params(params, f_node, f_edge, f_u):
    """Build the single static param slab ONCE (cache it next to the params).

    Rows: [ W1_x ; W1_e ; W1_u ; zero-pad to K_pad ; W2 ; b1 ; b2 ; gamma ; beta ]
    (w1 rows reordered so the kernel's [nodes_agg | edges_agg | u] layout needs
    no in-kernel permutation).
    """
    Fx, Fe, Fu = f_node, f_edge, f_u
    H = params["w2"].shape[0]
    K = Fu + Fx + Fe
    K_pad = _round_up(K, 8)

    w1 = params["w1"].astype(jnp.float32)            # rows ordered [u; x; e]
    w1_r = jnp.concatenate([w1[Fu:Fu + Fx], w1[Fu + Fx:Fu + Fx + Fe], w1[:Fu]],
                           axis=0)                   # rows ordered [x; e; u]
    w1_pad = jnp.pad(w1_r, ((0, K_pad - K), (0, 0)))

    slab = jnp.concatenate(
        [w1_pad,
         params["w2"].astype(jnp.float32),
         params["b1"][None, :].astype(jnp.float32),
         params["b2"][None, :].astype(jnp.float32),
         params["gamma"][None, :].astype(jnp.float32),
         params["beta"][None, :].astype(jnp.float32)],
        axis=0)                                      # (K_pad + H + 4, H)
    return slab


def global_model_forward(x, node_index, edge_attr, edge_index, u, param_slab):
    """Pallas wrapper: pack dynamic inputs into 2 slabs, run one kernel."""
    B, Fu = u.shape
    n_nodes, Fx = x.shape
    n_edges, Fe = edge_attr.shape
    H = param_slab.shape[1]
    K_pad = param_slab.shape[0] - H - 4

    B_pad = _round_up(max(B, 8), 8)                  # sublane-dense output / MXU M
    R = n_nodes + n_edges + B_pad

    # Single block-diagonal dynamic slab: x, edge_attr, u (zero padding rows).
    dyn = jnp.zeros((R, K_pad), jnp.float32)
    dyn = dyn.at[:n_nodes, :Fx].set(x.astype(jnp.float32))
    dyn = dyn.at[n_nodes:n_nodes + n_edges, Fx:Fx + Fe].set(
        edge_attr.astype(jnp.float32))
    dyn = dyn.at[n_nodes + n_edges:n_nodes + n_edges + B,
                 Fx + Fe:Fx + Fe + Fu].set(u.astype(jnp.float32))

    # Single packed index row; trailing arange(B_pad) forms the identity block
    # that passes u through the same one-hot matmul.
    idx = jnp.concatenate([node_index.astype(jnp.int32),
                           edge_index.astype(jnp.int32),
                           jnp.arange(B_pad, dtype=jnp.int32)])[None, :]

    flops = 2 * B_pad * (R * K_pad + K_pad * H + H * H)
    bytes_accessed = 4 * (idx.size + dyn.size + param_slab.size + B_pad * H)

    vmem = pl.BlockSpec(memory_space=pltpu.MemorySpace.VMEM)
    out = pl.pallas_call(
        _global_model_kernel,
        out_shape=jax.ShapeDtypeStruct((B_pad, H), jnp.float32),
        in_specs=[vmem, vmem, vmem],
        out_specs=vmem,
        cost_estimate=pl.CostEstimate(flops=flops, transcendentals=B_pad,
                                      bytes_accessed=bytes_accessed),
    )(idx, dyn, param_slab)
    return out[:B]


def _reference(x, node_index, edge_attr, edge_index, u, params, num_graphs):
    """Pure-JAX reference of the PyTorch forward."""
    nodes_agg = jax.ops.segment_sum(x, node_index, num_segments=num_graphs)
    edges_agg = jax.ops.segment_sum(edge_attr, edge_index, num_segments=num_graphs)
    cat = jnp.concatenate([u, nodes_agg, edges_agg], axis=1)
    h = jnp.maximum(cat @ params["w1"] + params["b1"], 0.0)
    h2 = h @ params["w2"] + params["b2"]
    mean = jnp.mean(h2, axis=-1, keepdims=True)
    var = jnp.mean(jnp.square(h2 - mean), axis=-1, keepdims=True)
    return (h2 - mean) / jnp.sqrt(var + 1e-5) * params["gamma"] + params["beta"]


def _init_params(key, n_global_features, n_hidden):
    """Deterministic torch-Linear-style uniform init."""
    k1, k2, k3, k4 = jax.random.split(key, 4)
    b1_bound = 1.0 / jnp.sqrt(jnp.float32(n_global_features))
    b2_bound = 1.0 / jnp.sqrt(jnp.float32(n_hidden))
    return {
        "w1": jax.random.uniform(k1, (n_global_features, n_hidden), jnp.float32,
                                 -b1_bound, b1_bound),
        "b1": jax.random.uniform(k2, (n_hidden,), jnp.float32, -b1_bound, b1_bound),
        "w2": jax.random.uniform(k3, (n_hidden, n_hidden), jnp.float32,
                                 -b2_bound, b2_bound),
        "b2": jax.random.uniform(k4, (n_hidden,), jnp.float32, -b2_bound, b2_bound),
        "gamma": jnp.ones((n_hidden,), jnp.float32),   # LayerNorm init
        "beta": jnp.zeros((n_hidden,), jnp.float32),
    }


if __name__ == "__main__":
    key = jax.random.PRNGKey(0)
    k_x, k_e, k_u, k_ni, k_ei, k_p = jax.random.split(key, 6)

    num_graphs = 2       # B
    num_nodes = 16
    num_edges = 24
    f_node = 8           # Fx
    f_edge = 6           # Fe
    f_u = 4              # Fu
    n_global_features = f_u + f_node + f_edge   # 18 (matches cat dim)
    n_hidden = 32

    x = jax.random.normal(k_x, (num_nodes, f_node), jnp.float32)
    edge_attr = jax.random.normal(k_e, (num_edges, f_edge), jnp.float32)
    u = jax.random.normal(k_u, (num_graphs, f_u), jnp.float32)
    node_index = jax.random.randint(k_ni, (num_nodes,), 0, num_graphs, jnp.int32)
    edge_index = jax.random.randint(k_ei, (num_edges,), 0, num_graphs, jnp.int32)

    params = _init_params(k_p, n_global_features, n_hidden)
    param_slab = pack_params(params, f_node, f_edge, f_u)   # built once, reused

    out = global_model_forward(x, node_index, edge_attr, edge_index, u, param_slab)
    out = jax.block_until_ready(out)

    ref = _reference(x, node_index, edge_attr, edge_index, u, params, num_graphs)
    assert out.shape == (num_graphs, n_hidden)
    assert jnp.allclose(out, ref, atol=1e-4, rtol=1e-4), "mismatch vs JAX reference"

    print("KERNEL_OK")
</pallas_src>

<mosaic_0001>
module attributes {stable_mosaic.version = 11 : i64} {
  func.func @_global_model_kernel(%arg0: memref<1x48xi32, #tpu.memory_space<vmem>>, %arg1: memref<48x24xf32, #tpu.memory_space<vmem>>, %arg2: memref<60x32xf32, #tpu.memory_space<vmem>>, %arg3: memref<8x32xf32, #tpu.memory_space<vmem>>) attributes {dimension_semantics = [], scalar_prefetch = 0 : i64, scratch_operands = 0 : i64, tpu.core_type = #tpu.core_type<tc>} {
    %0 = tpu.iota {dimensions = array<i32: 0>} : vector<8x48xi32>
    %c0 = arith.constant 0 : index
    %c0_0 = arith.constant 0 : index
    %1 = vector.load %arg0[%c0, %c0_0] : memref<1x48xi32, #tpu.memory_space<vmem>>, vector<1x48xi32>
    %2 = vector.broadcast %1 : vector<1x48xi32> to vector<8x48xi32>
    %3 = arith.cmpi eq, %0, %2 : vector<8x48xi32>
    %4 = arith.extui %3 : vector<8x48xi1> to vector<8x48xi32>
    %5 = arith.sitofp %4 : vector<8x48xi32> to vector<8x48xf32>
    %c0_1 = arith.constant 0 : index
    %c0_2 = arith.constant 0 : index
    %6 = vector.load %arg1[%c0_1, %c0_2] : memref<48x24xf32, #tpu.memory_space<vmem>>, vector<48x24xf32>
    %cst = arith.constant dense<0.000000e+00> : vector<8x24xf32>
    %7 = tpu.matmul %5, %6, %cst {dimension_numbers = #tpu.dot_dimension_numbers<[1], [0], [0], [1], [0, 0, 1, 1], [], []>} : vector<8x48xf32>, vector<48x24xf32>, vector<8x24xf32> -> vector<8x24xf32>
    %c0_3 = arith.constant 0 : index
    %c0_4 = arith.constant 0 : index
    %8 = vector.load %arg2[%c0_3, %c0_4] : memref<60x32xf32, #tpu.memory_space<vmem>>, vector<24x32xf32>
    %c24 = arith.constant 24 : index
    %c0_5 = arith.constant 0 : index
    %9 = vector.load %arg2[%c24, %c0_5] : memref<60x32xf32, #tpu.memory_space<vmem>>, vector<32x32xf32>
    %c56 = arith.constant 56 : index
    %c0_6 = arith.constant 0 : index
    %10 = vector.load %arg2[%c56, %c0_6] : memref<60x32xf32, #tpu.memory_space<vmem>>, vector<4x32xf32>
    %11 = vector.extract_strided_slice %10 {offsets = [0, 0], sizes = [1, 32], strides = [1, 1]} : vector<4x32xf32> to vector<1x32xf32>
    %12 = vector.extract_strided_slice %10 {offsets = [1, 0], sizes = [1, 32], strides = [1, 1]} : vector<4x32xf32> to vector<1x32xf32>
    %13 = vector.extract_strided_slice %10 {offsets = [2, 0], sizes = [1, 32], strides = [1, 1]} : vector<4x32xf32> to vector<1x32xf32>
    %14 = vector.extract_strided_slice %10 {offsets = [3, 0], sizes = [1, 32], strides = [1, 1]} : vector<4x32xf32> to vector<1x32xf32>
    %cst_7 = arith.constant dense<0.000000e+00> : vector<8x32xf32>
    %15 = tpu.matmul %7, %8, %cst_7 {dimension_numbers = #tpu.dot_dimension_numbers<[1], [0], [0], [1], [0, 0, 1, 1], [], []>} : vector<8x24xf32>, vector<24x32xf32>, vector<8x32xf32> -> vector<8x32xf32>
    %16 = vector.broadcast %11 : vector<1x32xf32> to vector<8x32xf32>
    %17 = arith.addf %15, %16 : vector<8x32xf32>
    %cst_8 = arith.constant 0.000000e+00 : f32
    %18 = vector.broadcast %cst_8 : f32 to vector<8x32xf32>
    %19 = arith.maximumf %17, %18 : vector<8x32xf32>
    %cst_9 = arith.constant dense<0.000000e+00> : vector<8x32xf32>
    %20 = tpu.matmul %19, %9, %cst_9 {dimension_numbers = #tpu.dot_dimension_numbers<[1], [0], [0], [1], [0, 0, 1, 1], [], []>} : vector<8x32xf32>, vector<32x32xf32>, vector<8x32xf32> -> vector<8x32xf32>
    %21 = vector.broadcast %12 : vector<1x32xf32> to vector<8x32xf32>
    %22 = arith.addf %20, %21 : vector<8x32xf32>
    %cst_10 = arith.constant dense<0.000000e+00> : vector<8xf32>
    %23 = vector.multi_reduction <add>, %22, %cst_10 [1] : vector<8x32xf32> to vector<8xf32>
    %24 = vector.shape_cast %23 : vector<8xf32> to vector<8x1xf32>
    %cst_11 = arith.constant 3.200000e+01 : f32
    %25 = vector.broadcast %cst_11 : f32 to vector<8x1xf32>
    %26 = arith.divf %24, %25 : vector<8x1xf32>
    %27 = vector.broadcast %26 : vector<8x1xf32> to vector<8x32xf32>
    %28 = arith.subf %22, %27 : vector<8x32xf32>
    %29 = arith.mulf %28, %28 : vector<8x32xf32>
    %cst_12 = arith.constant dense<0.000000e+00> : vector<8xf32>
    %30 = vector.multi_reduction <add>, %29, %cst_12 [1] : vector<8x32xf32> to vector<8xf32>
    %31 = vector.shape_cast %30 : vector<8xf32> to vector<8x1xf32>
    %cst_13 = arith.constant 3.200000e+01 : f32
    %32 = vector.broadcast %cst_13 : f32 to vector<8x1xf32>
    %33 = arith.divf %31, %32 : vector<8x1xf32>
    %34 = vector.broadcast %26 : vector<8x1xf32> to vector<8x32xf32>
    %35 = arith.subf %22, %34 : vector<8x32xf32>
    %cst_14 = arith.constant 9.99999974E-6 : f32
    %36 = vector.broadcast %cst_14 : f32 to vector<8x1xf32>
    %37 = arith.addf %33, %36 : vector<8x1xf32>
    %38 = math.rsqrt %37 : vector<8x1xf32>
    %39 = vector.broadcast %38 : vector<8x1xf32> to vector<8x32xf32>
    %40 = arith.mulf %35, %39 : vector<8x32xf32>
    %41 = vector.broadcast %13 : vector<1x32xf32> to vector<8x32xf32>
    %42 = arith.mulf %40, %41 : vector<8x32xf32>
    %43 = vector.broadcast %14 : vector<1x32xf32> to vector<8x32xf32>
    %44 = arith.addf %42, %43 : vector<8x32xf32>
    %c0_15 = arith.constant 0 : index
    %c0_16 = arith.constant 0 : index
    %45 = vector.load %arg3[%c0_15, %c0_16] : memref<8x32xf32, #tpu.memory_space<vmem>>, vector<8x32xf32>
    tpu.vector_store %arg3[%c0_15, %c0_16], %44 {strides = array<i32>} : memref<8x32xf32, #tpu.memory_space<vmem>>, vector<8x32xf32>,
    return
  }
}

</mosaic_0001>

<bundles_post_ra>
// kernel: tpu_custom_call.1
= control target key start
LH: loop header
LB: loop body
LE: loop exit
PB: predicated region body
PF: predicated region fallthrough
CT: control target
= control target key end

     0   :  { %v15_v1 = vlaneseq  ;;  %v392_v2 = vmov 0.0   ;;  %vm393_vm0 = vmmov 0   ;;  %s477_s0 = inlined_call_operand.vmem [shape: s32[1,48], index: 0, kind: input, shape index: {}]   ;;  %s478_s1 = inlined_call_operand.vmem [shape: f32[48,24], index: 1, kind: input, shape index: {}]   ;;  %s479_s2 = inlined_call_operand.vmem [shape: f32[60,32], index: 2, kind: input, shape index: {}]   ;;  %s480_s3 = inlined_call_operand.hbm [shape: f32[8,32], index: 3, kind: output, shape index: {}]  }
   0x1   :  { %v30_v0 = vld [vmem:[%s478_s1 + $0x28] sm:$0xff]  ;;  %330 = vmatprep.subr.mxu0 %v392_v2  ;;  %v29_v3 = vld [vmem:[%s478_s1 + $0x20] sm:$0xff]  ;;  %342 = vmatprep.mubr.msk.f32.mxu0 %vm393_vm0, %v392_v2  ;;  %v107_v4 = vld [vmem:[%s479_s2 + $0x10] sm:$0xff] }
   0x2   :  { %331 = vmatpush3.msra.mxu0 %v30_v0  ;;  %345 = vmatprep.subr.mxu1 %v392_v2  ;;  %v106_v5 = vld [vmem:[%s479_s2 + $0x8] sm:$0xff]  ;;  %v28_v6 = vld [vmem:[%s478_s1 + $0x18] sm:$0xff]  ;;  %v431_v7 = vshrl.u32 %v15_v1, 7 }
   0x3   :  { %332 = vmatprep.subr.mxu0 %v392_v2  ;;  %346 = vmatpush3.msra.mxu1 %v107_v4 }
   0x4   :  { %8 = vsyncpa [#allocation3], 0  ;;  %333 = vmatpush3.msra.mxu0 %v29_v3  ;;  %v309_v8 = vld [vmem:[%s477_s0] ss:$0 sm:$0xff]  ;;  %347 = vmatprep.subr.mxu1 %v392_v2  ;;  %v27_v9 = vld [vmem:[%s478_s1 + $0x10] sm:$0xff]  ;;  %vm31_vm2 = vcmask 392192  }
   0x5   :  { %334 = vmatprep.subr.mxu0 %v392_v2  ;;  %348 = vmatpush3.msra.mxu1 %v106_v5  ;;  %v26_v10 = vld [vmem:[%s478_s1 + $0x8] sm:$0xff]  ;;  %vm22_vm1 = vcmp.eq.s32.totalorder %v431_v7, %v309_v8  ;;  %v25_v11 = vld [vmem:[%s478_s1] sm:$0xff]  ;;  %vm117_vm3 = vcmask 195584   ;;  %v111_v14 = vld [vmem:[%s479_s2 + $0x30] sm:$0xff]  ;;  %v115_v20 = vsub.s32 0, %v431_v7  ;;  %vm196_vm4 = vcmask 261120  }
   0x6   :  { %335 = vmatpush3.msra.mxu0 %v28_v6  ;;  %349 = vmatprep.subr.mxu1 %v392_v2  ;;  %v310_v12 = vsel %vm22_vm1, 1.0, %v392_v2  ;;  %v105_v13 = vld [vmem:[%s479_s2] sm:$0xff]  ;;  %v110_v17 = vld [vmem:[%s479_s2 + $0x28] sm:$0xff]  ;;  %v108_v19 = vld [vmem:[%s479_s2 + $0x18] sm:$0xff]  ;;  %v194_v27 = vsub.s32 1, %v431_v7  ;;  %v286_v41 = vsub.s32 2, %v431_v7 }
   0x7   :  { %336 = vmatprep.subr.mxu0 %v392_v2  ;;  %351 = vmatprep.mubr.msk.f32.mxu1 %vm393_vm0, %v392_v2  ;;  %v109_v18 = vld [vmem:[%s479_s2 + $0x20] sm:$0xff]  ;;  %v112_v21 = vld [vmem:[%s479_s2 + $0x38] sm:$0xf]  ;;  %v291_v42 = vsub.s32 3, %v431_v7  ;;  %s394_s2 = smov [#allocation2]  }
   0x8   :  { %337 = vmatpush3.msra.mxu0 %v27_v9  ;;  %350 = vmatpush3.msra.mxu1 %v105_v13  ;;  %v116_v22 = vrot.slane %v112_v21, %v115_v20  ;;  %v195_v28 = vrot.slane %v112_v21, %v194_v27  ;;  %v287_v43 = vrot.slane %v112_v21, %v286_v41  ;;  %s301_s13 = sshll.u32 %s394_s2, 4  ;;  %s302_s13 = int_to_ptr.vmem [resolvable:$true] %s301_s13 }
   0x9   :  { %338 = vmatprep.subr.mxu0 %v392_v2  ;;  %354 = vmatprep.subr.mxu1 %v392_v2  ;;  %v292_v46 = vrot.slane %v112_v21, %v291_v42  ;;  %s370_s14 = scalar_lea.vmem %s302_s13, 128  ;;  %p375_p1 = scmp.lt.s32.totalorder %s302_s13, %s302_s13 }
   0xa   :  { %339 = vmatpush3.msra.mxu0 %v26_v10  ;;  %p371_p0 = scmp.ne.s32.totalorder %s302_s13, %s370_s14  ;;  %p376_p2 = scmp.lt.s32.totalorder %s370_s14, %s370_s14 }
   0xb   :  { %340 = vmatprep.subr.mxu0 %v392_v2 }
   0xc   :  { %341 = vmatpush3.msra.mxu0 %v25_v11  ;;  %p377_p3 = por %p376_p2, %p375_p1 }
   0xd   :  { %343 = vmatmul.mubr.msk.f32.vlgmr.msra.gmra.mxu0 %vm31_vm2, %v310_v12 }
   0xe   :  { %p378_p4 = pnand %p377_p3, %p371_p0 }
  0xcd   :  { %v101_v15 = vpop.f32.mrf.mxu0 }
  0xce   :  { %352 = vmatmul.mubr.msk.f32.vlgmr.msra.gmra.mxu1 %vm117_vm3, %v101_v15 }
  0xcf   :  { %v344_v16 = vpop.f32.mrf.mxu0  ;;  %355 = vmatpush3.msra.mxu1 %v111_v14  ;;  %362 = vmatprep.mubr.msk.f32.mxu1 %vm393_vm0, %v392_v2 }
  0xd0   :  { %356 = vmatprep.subr.mxu1 %v392_v2 }
  0xd1   :  { %357 = vmatpush3.msra.mxu1 %v110_v17 }
  0xd2   :  { %358 = vmatprep.subr.mxu1 %v392_v2 }
  0xd3   :  { %359 = vmatpush3.msra.mxu1 %v109_v18 }
  0xd4   :  { %360 = vmatprep.subr.mxu1 %v392_v2 }
  0xd5   :  { %361 = vmatpush3.msra.mxu1 %v108_v19 }
 0x18e   :  { %v187_v23 = vpop.f32.mrf.mxu1 }
 0x18f   :  { %v188_v24 = vadd.f32 %v187_v23, %v116_v22 }
 0x190   :  { %v353_v25 = vpop.f32.mrf.mxu1 }
 0x191   :  { %v191_v26 = vmax.f32 %v188_v24, 0.0 }
 0x193   :  { %363 = vmatmul.mubr.msk.f32.vlgmr.msra.gmra.mxu1 %vm196_vm4, %v191_v26 }
 0x253   :  { %v266_v29 = vpop.f32.mrf.mxu1 }
 0x254   :  { %v267_v30 = vadd.f32 %v266_v29, %v195_v28 }
 0x255   :  { %v364_v31 = vpop.f32.mrf.mxu1 }
 0x256   :  { %v270_v32 = vsel %vm196_vm4, %v267_v30, 0.0 }
 0x257   :  { %271 = vadd.xlane.f32.xlu0 %v270_v32 }
 0x2e0   :  { %v272_v33 = vpop.xlane.xlu0 %271 }
 0x2e1   :  { %v274_v34 = vmul.f32 0.03125, %v272_v33 }
 0x2e3   :  { %v275_v35 = vsub.f32 %v267_v30, %v274_v34 }
 0x2e5   :  { %v276_v36 = vmul.f32 %v275_v35, %v275_v35 }
 0x2e7   :  { %v277_v37 = vsel %vm196_vm4, %v276_v36, 0.0 }
 0x2e8   :  { %278 = vadd.xlane.f32.xlu0 %v277_v37 }
 0x371   :  { %v279_v38 = vpop.xlane.xlu0 %278 }
 0x372   :  { %v280_v39 = vmul.f32 0.03125, %v279_v38 }
 0x374   :  { %v281_v40 = vadd.f32 1e-05, %v280_v39 }
 0x376   :  { %368 = vrsqrt.f32 %v281_v40 }
 0x383   :  { %v369_v44 = vpop.eup %368 }
 0x384   :  { %v283_v45 = vmul.f32 %v369_v44, %v275_v35 }
 0x386   :  { %v288_v47 = vmul.f32 %v287_v43, %v283_v45 }
 0x388   :  { %v293_v48 = vadd.f32 %v292_v46, %v288_v47 }
 0x38a   :  { %294 = vst.msk [vmem:[#allocation2] sm:$0xff] %vm196_vm4, %v293_v48 }
 0x38b   :  { %381 = shalt.err (!%p378_p4)
}
 0x38c   :  { %304 = dma.vmem_to_hbm [thread:$0]  %s302_s13, 128, %s480_s3, [#allocation3]  }
 0x38d   :  { %390 = dma.done.wait [#allocation3], 128  }
 0x38e   :  { %391 = vsyncadd [#allocation3], 4294967168 }
 0x38f   :  { %308 = vsyncpa [#allocation3], 1 }

</bundles_post_ra>
